<compile_context>
chip_gen: v7x
topology: tpu7x:2x2x1
jax: 0.10.0
libtpu: 0.0.40
codegen_flags: <defaults>
</compile_context>

<pallas_src>
import math
import functools

import jax
import jax.numpy as jnp
from jax.experimental import pallas as pl
from jax.experimental.pallas import tpu as pltpu

F32 = jnp.float32
BF16 = jnp.bfloat16
VMEM_LIMIT = 64 * 1024 * 1024


# ----------------------------------------------------------------------------
# In-kernel helpers
# ----------------------------------------------------------------------------
def _layernorm(x, alpha, beta, d):
    # Matches the module's LayerNorm: alpha*(x-mean)/(std+1e-7)+beta with the
    # *unbiased* torch.std (divides by d-1).
    mean = jnp.mean(x, axis=-1, keepdims=True)
    diff = x - mean
    var = jnp.sum(diff * diff, axis=-1, keepdims=True) * (1.0 / (d - 1))
    inv = 1.0 / (jnp.sqrt(var) + 1e-7)
    return alpha * (diff * inv) + beta


def _qkv_from(x1, wq, bq, wk, bk, wv, bv, scale):
    # Shared LN1-output -> Q/K/V projection (bf16 MXU operands, f32 accumulate).
    xb = x1.astype(BF16)
    q = jnp.dot(xb, wq, preferred_element_type=F32) + bq
    k = jnp.dot(xb, wk, preferred_element_type=F32) + bk
    v = jnp.dot(xb, wv, preferred_element_type=F32) + bv
    return (q * scale).astype(BF16), k.astype(BF16), v.astype(BF16)


def _row_tile(n):
    for t in (512, 256, 128, 64, 32, 16, 8):
        if n >= t and n % t == 0:
            return t
    return n


def _cparams():
    return pltpu.CompilerParams(dimension_semantics=("parallel",),
                                vmem_limit_bytes=VMEM_LIMIT)


def _const_spec(shape):
    return pl.BlockSpec(shape, lambda r, _n=len(shape): (0,) * _n)


# ----------------------------------------------------------------------------
# Kernel A: LayerNorm1 + Q/K/V projections (layer 0 only)
# ----------------------------------------------------------------------------
def qkv_kernel(x_ref, a1_ref, be1_ref,
               wq_ref, bq_ref, wk_ref, bk_ref, wv_ref, bv_ref,
               q_ref, k_ref, v_ref, *, d_model, scale):
    x1 = _layernorm(x_ref[...], a1_ref[...], be1_ref[...], d_model)
    q, k, v = _qkv_from(x1, wq_ref[...], bq_ref[...], wk_ref[...], bk_ref[...],
                        wv_ref[...], bv_ref[...], scale)
    q_ref[...] = q
    k_ref[...] = k
    v_ref[...] = v


# ----------------------------------------------------------------------------
# Kernel B: attention over ALL heads per batch step (grid over B)
# ----------------------------------------------------------------------------
def attn_kernel(q_ref, k_ref, v_ref, m_ref, o_ref):
    q = q_ref[0]                                                # (H, S, dh) bf16, pre-scaled
    k = k_ref[0]                                                # (H, S, dh) bf16
    v = v_ref[0]                                                # (H, S, dh) bf16
    m = m_ref[0]                                                # (S, S) int32
    s = jnp.einsum("hqd,hkd->hqk", q, k, preferred_element_type=F32)
    s = jnp.where(m[None, :, :] == 0, jnp.float32(-1e9), s)     # masked_fill(mask==0, -1e9)
    s = s - jnp.max(s, axis=-1, keepdims=True)
    e = jnp.exp(s)
    p = e * pl.reciprocal(jnp.sum(e, axis=-1, keepdims=True), approx=True)
    o = jnp.einsum("hqk,hkd->hqd", p.astype(BF16), v, preferred_element_type=F32)
    o_ref[0] = o.astype(BF16)


# ----------------------------------------------------------------------------
# Kernel C (mid layers): out-proj + residual + LN2 + FFN + residual
#                        + next layer's LN1 + Q/K/V (fused epilogue)
# ----------------------------------------------------------------------------
def out_ffn_qkv_kernel(x_ref, attn_ref,
                       wo_ref, bo_ref, a2_ref, be2_ref,
                       w1_ref, b1_ref, w2_ref, b2_ref,
                       a1n_ref, be1n_ref,
                       wqn_ref, bqn_ref, wkn_ref, bkn_ref, wvn_ref, bvn_ref,
                       xo_ref, q_ref, k_ref, v_ref, *, d_model, scale):
    x = x_ref[...]                                              # (TM, D) f32 residual stream
    a = attn_ref[...]                                           # (TM, D) bf16 concat'd heads
    o = jnp.dot(a, wo_ref[...], preferred_element_type=F32) + bo_ref[...]
    x2 = x + o                                                  # residual 1 (dropout = identity)
    y = _layernorm(x2, a2_ref[...], be2_ref[...], d_model)
    h = jnp.maximum(
        jnp.dot(y.astype(BF16), w1_ref[...], preferred_element_type=F32) + b1_ref[...], 0.0)
    f = jnp.dot(h.astype(BF16), w2_ref[...], preferred_element_type=F32) + b2_ref[...]
    out = x2 + f                                                # residual 2 (dropout = identity)
    xo_ref[...] = out                                           # residual stream for next layer
    # fused next-layer LN1 + QKV (saves an HBM read of `out` and a kernel launch)
    x1n = _layernorm(out, a1n_ref[...], be1n_ref[...], d_model)
    q, k, v = _qkv_from(x1n, wqn_ref[...], bqn_ref[...], wkn_ref[...], bkn_ref[...],
                        wvn_ref[...], bvn_ref[...], scale)
    q_ref[...] = q
    k_ref[...] = k
    v_ref[...] = v


# ----------------------------------------------------------------------------
# Kernel C (last layer): out-proj + residual + LN2 + FFN + residual + final LN
# ----------------------------------------------------------------------------
def out_ffn_final_kernel(x_ref, attn_ref,
                         wo_ref, bo_ref, a2_ref, be2_ref,
                         w1_ref, b1_ref, w2_ref, b2_ref,
                         af_ref, bf_ref, o_ref, *, d_model):
    x = x_ref[...]
    a = attn_ref[...]
    o = jnp.dot(a, wo_ref[...], preferred_element_type=F32) + bo_ref[...]
    x2 = x + o
    y = _layernorm(x2, a2_ref[...], be2_ref[...], d_model)
    h = jnp.maximum(
        jnp.dot(y.astype(BF16), w1_ref[...], preferred_element_type=F32) + b1_ref[...], 0.0)
    f = jnp.dot(h.astype(BF16), w2_ref[...], preferred_element_type=F32) + b2_ref[...]
    out = x2 + f
    o_ref[...] = _layernorm(out, af_ref[...], bf_ref[...], d_model)   # EncoderBlock final LN


# ----------------------------------------------------------------------------
# pallas_call wrappers
# ----------------------------------------------------------------------------
def _qkv_call(x2d, lp, *, R, D, dh):
    TM = _row_tile(R)
    NR = R // TM
    row = pl.BlockSpec((TM, D), lambda r: (r, 0))
    return pl.pallas_call(
        functools.partial(qkv_kernel, d_model=D, scale=1.0 / math.sqrt(dh)),
        grid=(NR,),
        in_specs=[row,
                  _const_spec((1, D)), _const_spec((1, D)),           # alpha1, beta1
                  _const_spec((D, D)), _const_spec((1, D)),           # Wq, bq
                  _const_spec((D, D)), _const_spec((1, D)),           # Wk, bk
                  _const_spec((D, D)), _const_spec((1, D))],          # Wv, bv
        out_specs=[row] * 3,
        out_shape=[jax.ShapeDtypeStruct((R, D), BF16)] * 3,
        compiler_params=_cparams(),
    )(x2d, lp["alpha1"], lp["beta1"],
      lp["wq"], lp["bq"], lp["wk"], lp["bk"], lp["wv"], lp["bv"])


def _attention_call(q, k, v, mask, *, B, S, D, H):
    dh = D // H
    # PyTorch-style flat head view — metadata-only reshape of the HBM arrays.
    q4 = q.reshape(B, H, S, dh)
    k4 = k.reshape(B, H, S, dh)
    v4 = v.reshape(B, H, S, dh)
    head = pl.BlockSpec((1, H, S, dh), lambda b: (b, 0, 0, 0))
    attn = pl.pallas_call(
        attn_kernel,
        grid=(B,),
        in_specs=[head, head, head,
                  pl.BlockSpec((1, S, S), lambda b: (b, 0, 0))],
        out_specs=head,
        out_shape=jax.ShapeDtypeStruct((B, H, S, dh), BF16),
        compiler_params=_cparams(),
    )(q4, k4, v4, mask)
    return attn.reshape(B * S, D)                               # flat concat of heads


def _out_ffn_qkv_call(x2d, attn2d, lp, nxt, *, R, D, dh):
    hidden = lp["w1"].shape[1]
    TM = _row_tile(R)
    NR = R // TM
    row = pl.BlockSpec((TM, D), lambda r: (r, 0))
    return pl.pallas_call(
        functools.partial(out_ffn_qkv_kernel, d_model=D, scale=1.0 / math.sqrt(dh)),
        grid=(NR,),
        in_specs=[row, row,
                  _const_spec((D, D)), _const_spec((1, D)),           # Wo, bo
                  _const_spec((1, D)), _const_spec((1, D)),           # alpha2, beta2
                  _const_spec((D, hidden)), _const_spec((1, hidden)),  # W1, b1
                  _const_spec((hidden, D)), _const_spec((1, D)),      # W2, b2
                  _const_spec((1, D)), _const_spec((1, D)),           # next alpha1, beta1
                  _const_spec((D, D)), _const_spec((1, D)),           # next Wq, bq
                  _const_spec((D, D)), _const_spec((1, D)),           # next Wk, bk
                  _const_spec((D, D)), _const_spec((1, D))],          # next Wv, bv
        out_specs=[row] * 4,
        out_shape=[jax.ShapeDtypeStruct((R, D), F32)]
                 + [jax.ShapeDtypeStruct((R, D), BF16)] * 3,
        compiler_params=_cparams(),
    )(x2d, attn2d,
      lp["wo"], lp["bo"], lp["alpha2"], lp["beta2"],
      lp["w1"], lp["b1"], lp["w2"], lp["b2"],
      nxt["alpha1"], nxt["beta1"],
      nxt["wq"], nxt["bq"], nxt["wk"], nxt["bk"], nxt["wv"], nxt["bv"])


def _out_ffn_final_call(x2d, attn2d, lp, alpha_f, beta_f, *, R, D):
    hidden = lp["w1"].shape[1]
    TM = _row_tile(R)
    NR = R // TM
    row = pl.BlockSpec((TM, D), lambda r: (r, 0))
    return pl.pallas_call(
        functools.partial(out_ffn_final_kernel, d_model=D),
        grid=(NR,),
        in_specs=[row, row,
                  _const_spec((D, D)), _const_spec((1, D)),           # Wo, bo
                  _const_spec((1, D)), _const_spec((1, D)),           # alpha2, beta2
                  _const_spec((D, hidden)), _const_spec((1, hidden)),  # W1, b1
                  _const_spec((hidden, D)), _const_spec((1, D)),      # W2, b2
                  _const_spec((1, D)), _const_spec((1, D))],          # final alpha, beta
        out_specs=row,
        out_shape=jax.ShapeDtypeStruct((R, D), F32),
        compiler_params=_cparams(),
    )(x2d, attn2d,
      lp["wo"], lp["bo"], lp["alpha2"], lp["beta2"],
      lp["w1"], lp["b1"], lp["w2"], lp["b2"], alpha_f, beta_f)


# ----------------------------------------------------------------------------
# Full EncoderBlock wrapper
# ----------------------------------------------------------------------------
def encoder_block(src, mask, params):
    B, S = src.shape
    emb = params["embed"]
    D = emb.shape[1]
    H = params["n_heads"]
    dh = D // H
    R = B * S
    # nn.Embedding gather + positional encoding: one-line JAX glue (trivial gather/add).
    x = emb[src].astype(F32) + params["pe"][:S][None, :, :]
    mask = mask.astype(jnp.int32)
    x2d = x.reshape(R, D)
    layers = params["layers"]

    # Layer 0's LN1 + QKV (subsequent layers get theirs fused into the previous epilogue).
    q, k, v = _qkv_call(x2d, layers[0], R=R, D=D, dh=dh)

    for i, lp in enumerate(layers):
        attn2d = _attention_call(q, k, v, mask, B=B, S=S, D=D, H=H)
        if i + 1 < len(layers):
            x2d, q, k, v = _out_ffn_qkv_call(x2d, attn2d, lp, layers[i + 1], R=R, D=D, dh=dh)
        else:
            x2d = _out_ffn_final_call(x2d, attn2d, lp,
                                      params["alpha_f"], params["beta_f"], R=R, D=D)
    return x2d.reshape(B, S, D)


# ----------------------------------------------------------------------------
# Plain-JAX f32 reference (mirrors the PyTorch forward exactly) for verification.
# ----------------------------------------------------------------------------
def reference(src, mask, params):
    B, S = src.shape
    D = params["embed"].shape[1]
    H = params["n_heads"]
    dh = D // H

    def ln(t, a, b):
        mean = t.mean(-1, keepdims=True)
        std = jnp.sqrt(((t - mean) ** 2).sum(-1, keepdims=True) / (t.shape[-1] - 1))
        return a * (t - mean) / (std + 1e-7) + b

    x = params["embed"][src].astype(F32) + params["pe"][:S][None]
    for lp in params["layers"]:
        wq, wk, wv, wo = (lp[n].astype(F32) for n in ("wq", "wk", "wv", "wo"))
        w1, w2 = lp["w1"].astype(F32), lp["w2"].astype(F32)
        x1 = ln(x, lp["alpha1"], lp["beta1"])
        q = (x1 @ wq + lp["bq"]).reshape(B, H, S, dh)
        k = (x1 @ wk + lp["bk"]).reshape(B, H, S, dh)
        v = (x1 @ wv + lp["bv"]).reshape(B, H, S, dh)
        s = jnp.einsum("bhqd,bhkd->bhqk", q, k) / math.sqrt(dh)
        s = jnp.where(mask[:, None] == 0, jnp.float32(-1e9), s)
        p = jax.nn.softmax(s, axis=-1)
        o = jnp.einsum("bhqk,bhkd->bhqd", p, v).reshape(B, S, D)
        o = o @ wo + lp["bo"]
        x2 = x + o
        y = ln(x2, lp["alpha2"], lp["beta2"])
        h = jnp.maximum(y @ w1 + lp["b1"], 0.0)
        x = x2 + h @ w2 + lp["b2"]
    return ln(x, params["alpha_f"], params["beta_f"])


# ----------------------------------------------------------------------------
if __name__ == "__main__":
    B, S = 2, 8
    vocab, d_model, n_heads, num_layers = 50, 32, 4, 2
    hidden = 2048                      # FeedForward default hidden_size

    key = jax.random.PRNGKey(0)
    kE, kA, kSrc, kLayers = jax.random.split(key, 4)

    def w(k, shape, scale=0.05):
        return (scale * jax.random.normal(k, shape)).astype(F32)

    def ln_params(k):
        k1, k2 = jax.random.split(k)
        return ((1.0 + 0.1 * jax.random.normal(k1, (1, d_model))).astype(F32),
                (0.1 * jax.random.normal(k2, (1, d_model))).astype(F32))

    def make_layer(k):
        ks = jax.random.split(k, 14)
        a1, b1n = ln_params(ks[12])
        a2, b2n = ln_params(ks[13])
        return {
            "alpha1": a1, "beta1": b1n,
            # matmul weights stored bf16 at the call boundary (MXU-native rate)
            "wq": w(ks[0], (d_model, d_model)).astype(BF16), "bq": w(ks[1], (1, d_model)),
            "wk": w(ks[2], (d_model, d_model)).astype(BF16), "bk": w(ks[3], (1, d_model)),
            "wv": w(ks[4], (d_model, d_model)).astype(BF16), "bv": w(ks[5], (1, d_model)),
            "wo": w(ks[6], (d_model, d_model)).astype(BF16), "bo": w(ks[7], (1, d_model)),
            "alpha2": a2, "beta2": b2n,
            "w1": w(ks[8], (d_model, hidden)).astype(BF16),  "b1": w(ks[9], (1, hidden)),
            "w2": w(ks[10], (hidden, d_model)).astype(BF16), "b2": w(ks[11], (1, d_model)),
        }

    # Positional encoding exactly as Pos_Encoder builds it (max_len=80).
    max_len = 80
    pos = jnp.arange(max_len, dtype=F32)[:, None]
    i_even = jnp.arange(0, d_model, 2, dtype=F32)
    angle = pos / jnp.power(10000.0, i_even / d_model)
    pe = jnp.zeros((max_len, d_model), F32)
    pe = pe.at[:, 0::2].set(jnp.sin(angle))
    pe = pe.at[:, 1::2].set(jnp.cos(angle))

    af, bfin = ln_params(kA)
    params = {
        "n_heads": n_heads,
        "embed": jax.random.normal(kE, (vocab, d_model)).astype(F32),
        "pe": pe,
        "layers": [make_layer(k) for k in jax.random.split(kLayers, num_layers)],
        "alpha_f": af, "beta_f": bfin,
    }

    src = jax.random.randint(kSrc, (B, S), 0, vocab)
    # causal-ish mask (1 = keep, 0 = masked), matching `masked_fill(mask == 0, -1e9)`
    mask = jnp.broadcast_to(jnp.tril(jnp.ones((S, S), jnp.int32)), (B, S, S)).astype(jnp.int32)

    out = jax.block_until_ready(encoder_block(src, mask, params))
    ref = jax.block_until_ready(reference(src, mask, params))

    assert out.shape == (B, S, d_model)
    # bf16 MXU operands + approx reciprocal loosen numerics slightly vs the f32 reference.
    assert jnp.allclose(out, ref, atol=5e-2, rtol=5e-2), (
        "max abs diff = %f" % float(jnp.max(jnp.abs(out - ref))))
    print("KERNEL_OK")
</pallas_src>

<mosaic_0001>
module attributes {stable_mosaic.version = 11 : i64} {
  func.func @qkv_kernel(%arg0: i32, %arg1: memref<16x32xf32, #tpu.memory_space<vmem>>, %arg2: memref<1x32xf32, #tpu.memory_space<vmem>>, %arg3: memref<1x32xf32, #tpu.memory_space<vmem>>, %arg4: memref<32x32xbf16, #tpu.memory_space<vmem>>, %arg5: memref<1x32xf32, #tpu.memory_space<vmem>>, %arg6: memref<32x32xbf16, #tpu.memory_space<vmem>>, %arg7: memref<1x32xf32, #tpu.memory_space<vmem>>, %arg8: memref<32x32xbf16, #tpu.memory_space<vmem>>, %arg9: memref<1x32xf32, #tpu.memory_space<vmem>>, %arg10: memref<16x32xbf16, #tpu.memory_space<vmem>>, %arg11: memref<16x32xbf16, #tpu.memory_space<vmem>>, %arg12: memref<16x32xbf16, #tpu.memory_space<vmem>>) attributes {dimension_semantics = [#tpu.dimension_semantics<parallel>], iteration_bounds = array<i64: 1>, scalar_prefetch = 0 : i64, scratch_operands = 0 : i64, tpu.core_type = #tpu.core_type<tc>, window_params = [{transform_indices = @transform_0, window_bounds = array<i64: 16, 32>}, {pipeline_mode = #tpu.pipeline_mode<synchronous>, transform_indices = @transform_1, window_bounds = array<i64: 1, 32>}, {pipeline_mode = #tpu.pipeline_mode<synchronous>, transform_indices = @transform_2, window_bounds = array<i64: 1, 32>}, {pipeline_mode = #tpu.pipeline_mode<synchronous>, transform_indices = @transform_3, window_bounds = array<i64: 32, 32>}, {pipeline_mode = #tpu.pipeline_mode<synchronous>, transform_indices = @transform_4, window_bounds = array<i64: 1, 32>}, {pipeline_mode = #tpu.pipeline_mode<synchronous>, transform_indices = @transform_5, window_bounds = array<i64: 32, 32>}, {pipeline_mode = #tpu.pipeline_mode<synchronous>, transform_indices = @transform_6, window_bounds = array<i64: 1, 32>}, {pipeline_mode = #tpu.pipeline_mode<synchronous>, transform_indices = @transform_7, window_bounds = array<i64: 32, 32>}, {pipeline_mode = #tpu.pipeline_mode<synchronous>, transform_indices = @transform_8, window_bounds = array<i64: 1, 32>}, {transform_indices = @transform_9, window_bounds = array<i64: 16, 32>}, {transform_indices = @transform_10, window_bounds = array<i64: 16, 32>}, {transform_indices = @transform_11, window_bounds = array<i64: 16, 32>}]} {
    %c0 = arith.constant 0 : index
    %c0_0 = arith.constant 0 : index
    %0 = vector.load %arg1[%c0, %c0_0] : memref<16x32xf32, #tpu.memory_space<vmem>>, vector<16x32xf32>
    %c0_1 = arith.constant 0 : index
    %c0_2 = arith.constant 0 : index
    %1 = vector.load %arg2[%c0_1, %c0_2] : memref<1x32xf32, #tpu.memory_space<vmem>>, vector<1x32xf32>
    %c0_3 = arith.constant 0 : index
    %c0_4 = arith.constant 0 : index
    %2 = vector.load %arg3[%c0_3, %c0_4] : memref<1x32xf32, #tpu.memory_space<vmem>>, vector<1x32xf32>
    %cst = arith.constant dense<0.000000e+00> : vector<16xf32>
    %3 = vector.multi_reduction <add>, %0, %cst [1] : vector<16x32xf32> to vector<16xf32>
    %4 = vector.shape_cast %3 : vector<16xf32> to vector<16x1xf32>
    %cst_5 = arith.constant 3.200000e+01 : f32
    %5 = vector.broadcast %cst_5 : f32 to vector<16x1xf32>
    %6 = arith.divf %4, %5 : vector<16x1xf32>
    %7 = vector.broadcast %6 : vector<16x1xf32> to vector<16x32xf32>
    %8 = arith.subf %0, %7 : vector<16x32xf32>
    %9 = arith.mulf %8, %8 : vector<16x32xf32>
    %cst_6 = arith.constant dense<0.000000e+00> : vector<16xf32>
    %10 = vector.multi_reduction <add>, %9, %cst_6 [1] : vector<16x32xf32> to vector<16xf32>
    %11 = vector.shape_cast %10 : vector<16xf32> to vector<16x1xf32>
    %cst_7 = arith.constant 0.0322580636 : f32
    %12 = vector.broadcast %cst_7 : f32 to vector<16x1xf32>
    %13 = arith.mulf %11, %12 : vector<16x1xf32>
    %14 = math.sqrt %13 : vector<16x1xf32>
    %cst_8 = arith.constant 1.000000e-07 : f32
    %15 = vector.broadcast %cst_8 : f32 to vector<16x1xf32>
    %16 = arith.addf %14, %15 : vector<16x1xf32>
    %cst_9 = arith.constant 1.000000e+00 : f32
    %17 = vector.broadcast %cst_9 : f32 to vector<16x1xf32>
    %18 = arith.divf %17, %16 : vector<16x1xf32>
    %19 = vector.broadcast %18 : vector<16x1xf32> to vector<16x32xf32>
    %20 = arith.mulf %8, %19 : vector<16x32xf32>
    %21 = vector.broadcast %1 : vector<1x32xf32> to vector<16x32xf32>
    %22 = arith.mulf %21, %20 : vector<16x32xf32>
    %23 = vector.broadcast %2 : vector<1x32xf32> to vector<16x32xf32>
    %24 = arith.addf %22, %23 : vector<16x32xf32>
    %c0_10 = arith.constant 0 : index
    %c0_11 = arith.constant 0 : index
    %25 = vector.load %arg4[%c0_10, %c0_11] : memref<32x32xbf16, #tpu.memory_space<vmem>>, vector<32x32xbf16>
    %c0_12 = arith.constant 0 : index
    %c0_13 = arith.constant 0 : index
    %26 = vector.load %arg5[%c0_12, %c0_13] : memref<1x32xf32, #tpu.memory_space<vmem>>, vector<1x32xf32>
    %c0_14 = arith.constant 0 : index
    %c0_15 = arith.constant 0 : index
    %27 = vector.load %arg6[%c0_14, %c0_15] : memref<32x32xbf16, #tpu.memory_space<vmem>>, vector<32x32xbf16>
    %c0_16 = arith.constant 0 : index
    %c0_17 = arith.constant 0 : index
    %28 = vector.load %arg7[%c0_16, %c0_17] : memref<1x32xf32, #tpu.memory_space<vmem>>, vector<1x32xf32>
    %c0_18 = arith.constant 0 : index
    %c0_19 = arith.constant 0 : index
    %29 = vector.load %arg8[%c0_18, %c0_19] : memref<32x32xbf16, #tpu.memory_space<vmem>>, vector<32x32xbf16>
    %c0_20 = arith.constant 0 : index
    %c0_21 = arith.constant 0 : index
    %30 = vector.load %arg9[%c0_20, %c0_21] : memref<1x32xf32, #tpu.memory_space<vmem>>, vector<1x32xf32>
    %31 = arith.truncf %24 : vector<16x32xf32> to vector<16x32xbf16>
    %cst_22 = arith.constant dense<0.000000e+00> : vector<16x32xf32>
    %32 = tpu.matmul %31, %25, %cst_22 {dimension_numbers = #tpu.dot_dimension_numbers<[1], [0], [0], [1], [0, 0, 1, 1], [], []>} : vector<16x32xbf16>, vector<32x32xbf16>, vector<16x32xf32> -> vector<16x32xf32>
    %33 = vector.broadcast %26 : vector<1x32xf32> to vector<16x32xf32>
    %34 = arith.addf %32, %33 : vector<16x32xf32>
    %cst_23 = arith.constant dense<0.000000e+00> : vector<16x32xf32>
    %35 = tpu.matmul %31, %27, %cst_23 {dimension_numbers = #tpu.dot_dimension_numbers<[1], [0], [0], [1], [0, 0, 1, 1], [], []>} : vector<16x32xbf16>, vector<32x32xbf16>, vector<16x32xf32> -> vector<16x32xf32>
    %36 = vector.broadcast %28 : vector<1x32xf32> to vector<16x32xf32>
    %37 = arith.addf %35, %36 : vector<16x32xf32>
    %cst_24 = arith.constant dense<0.000000e+00> : vector<16x32xf32>
    %38 = tpu.matmul %31, %29, %cst_24 {dimension_numbers = #tpu.dot_dimension_numbers<[1], [0], [0], [1], [0, 0, 1, 1], [], []>} : vector<16x32xbf16>, vector<32x32xbf16>, vector<16x32xf32> -> vector<16x32xf32>
    %39 = vector.broadcast %30 : vector<1x32xf32> to vector<16x32xf32>
    %40 = arith.addf %38, %39 : vector<16x32xf32>
    %cst_25 = arith.constant 0.353553385 : f32
    %41 = vector.broadcast %cst_25 : f32 to vector<16x32xf32>
    %42 = arith.mulf %34, %41 : vector<16x32xf32>
    %43 = arith.truncf %42 : vector<16x32xf32> to vector<16x32xbf16>
    %44 = arith.truncf %37 : vector<16x32xf32> to vector<16x32xbf16>
    %45 = arith.truncf %40 : vector<16x32xf32> to vector<16x32xbf16>
    %c0_26 = arith.constant 0 : index
    %c0_27 = arith.constant 0 : index
    %46 = vector.load %arg10[%c0_26, %c0_27] : memref<16x32xbf16, #tpu.memory_space<vmem>>, vector<16x32xbf16>
    tpu.vector_store %arg10[%c0_26, %c0_27], %43 {strides = array<i32>} : memref<16x32xbf16, #tpu.memory_space<vmem>>, vector<16x32xbf16>,
    %c0_28 = arith.constant 0 : index
    %c0_29 = arith.constant 0 : index
    %47 = vector.load %arg11[%c0_28, %c0_29] : memref<16x32xbf16, #tpu.memory_space<vmem>>, vector<16x32xbf16>
    tpu.vector_store %arg11[%c0_28, %c0_29], %44 {strides = array<i32>} : memref<16x32xbf16, #tpu.memory_space<vmem>>, vector<16x32xbf16>,
    %c0_30 = arith.constant 0 : index
    %c0_31 = arith.constant 0 : index
    %48 = vector.load %arg12[%c0_30, %c0_31] : memref<16x32xbf16, #tpu.memory_space<vmem>>, vector<16x32xbf16>
    tpu.vector_store %arg12[%c0_30, %c0_31], %45 {strides = array<i32>} : memref<16x32xbf16, #tpu.memory_space<vmem>>, vector<16x32xbf16>,
    return
  }
  func.func @transform_0(%arg0: i32) -> (i32, i32) {
    %c0_i32 = arith.constant 0 : i32
    %c0_i32_0 = arith.constant 0 : i32
    return %arg0, %c0_i32 : i32, i32
  }
  func.func @transform_1(%arg0: i32) -> (i32, i32) {
    %c0_i32 = arith.constant 0 : i32
    %c0_i32_0 = arith.constant 0 : i32
    %c0_i32_1 = arith.constant 0 : i32
    return %c0_i32, %c0_i32_0 : i32, i32
  }
  func.func @transform_2(%arg0: i32) -> (i32, i32) {
    %c0_i32 = arith.constant 0 : i32
    %c0_i32_0 = arith.constant 0 : i32
    %c0_i32_1 = arith.constant 0 : i32
    return %c0_i32, %c0_i32_0 : i32, i32
  }
  func.func @transform_3(%arg0: i32) -> (i32, i32) {
    %c0_i32 = arith.constant 0 : i32
    %c0_i32_0 = arith.constant 0 : i32
    %c0_i32_1 = arith.constant 0 : i32
    return %c0_i32, %c0_i32_0 : i32, i32
  }
  func.func @transform_4(%arg0: i32) -> (i32, i32) {
    %c0_i32 = arith.constant 0 : i32
    %c0_i32_0 = arith.constant 0 : i32
    %c0_i32_1 = arith.constant 0 : i32
    return %c0_i32, %c0_i32_0 : i32, i32
  }
  func.func @transform_5(%arg0: i32) -> (i32, i32) {
    %c0_i32 = arith.constant 0 : i32
    %c0_i32_0 = arith.constant 0 : i32
    %c0_i32_1 = arith.constant 0 : i32
    return %c0_i32, %c0_i32_0 : i32, i32
  }
  func.func @transform_6(%arg0: i32) -> (i32, i32) {
    %c0_i32 = arith.constant 0 : i32
    %c0_i32_0 = arith.constant 0 : i32
    %c0_i32_1 = arith.constant 0 : i32
    return %c0_i32, %c0_i32_0 : i32, i32
  }
  func.func @transform_7(%arg0: i32) -> (i32, i32) {
    %c0_i32 = arith.constant 0 : i32
    %c0_i32_0 = arith.constant 0 : i32
    %c0_i32_1 = arith.constant 0 : i32
    return %c0_i32, %c0_i32_0 : i32, i32
  }
  func.func @transform_8(%arg0: i32) -> (i32, i32) {
    %c0_i32 = arith.constant 0 : i32
    %c0_i32_0 = arith.constant 0 : i32
    %c0_i32_1 = arith.constant 0 : i32
    return %c0_i32, %c0_i32_0 : i32, i32
  }
  func.func @transform_9(%arg0: i32) -> (i32, i32) {
    %c0_i32 = arith.constant 0 : i32
    %c0_i32_0 = arith.constant 0 : i32
    return %arg0, %c0_i32 : i32, i32
  }
  func.func @transform_10(%arg0: i32) -> (i32, i32) {
    %c0_i32 = arith.constant 0 : i32
    %c0_i32_0 = arith.constant 0 : i32
    return %arg0, %c0_i32 : i32, i32
  }
  func.func @transform_11(%arg0: i32) -> (i32, i32) {
    %c0_i32 = arith.constant 0 : i32
    %c0_i32_0 = arith.constant 0 : i32
    return %arg0, %c0_i32 : i32, i32
  }
}

</mosaic_0001>

<bundles_post_ra>
// kernel: tpu_custom_call.1
= control target key start
LH: loop header
LB: loop body
LE: loop exit
PB: predicated region body
PF: predicated region fallthrough
CT: control target
= control target key end

     0   :  { %17 = vsyncpa [#allocation3], 0  ;;  %s1141_s0 = inlined_call_operand.hbm [shape: f32[16,32], index: 0, kind: input, shape index: {}]   ;;  %s1142_s1 = inlined_call_operand.hbm [shape: f32[1,32], index: 1, kind: input, shape index: {}]   ;;  %s1143_s2 = inlined_call_operand.hbm [shape: f32[1,32], index: 2, kind: input, shape index: {}]   ;;  %s1144_s3 = inlined_call_operand.hbm [shape: bf16[32,32], index: 3, kind: input, shape index: {}]   ;;  %s1145_s4 = inlined_call_operand.hbm [shape: f32[1,32], index: 4, kind: input, shape index: {}]   ;;  %s1146_s5 = inlined_call_operand.hbm [shape: bf16[32,32], index: 5, kind: input, shape index: {}]   ;;  %s1147_s6 = inlined_call_operand.hbm [shape: f32[1,32], index: 6, kind: input, shape index: {}]   ;;  %s1148_s7 = inlined_call_operand.hbm [shape: bf16[32,32], index: 7, kind: input, shape index: {}]   ;;  %s1149_s8 = inlined_call_operand.hbm [shape: f32[1,32], index: 8, kind: input, shape index: {}]   ;;  %s1150_s9 = inlined_call_operand.hbm [shape: bf16[16,32], index: 9, kind: output, shape index: {0}]   ;;  %s1151_s10 = inlined_call_operand.hbm [shape: bf16[16,32], index: 10, kind: output, shape index: {1}]   ;;  %s1152_s11 = inlined_call_operand.hbm [shape: bf16[16,32], index: 11, kind: output, shape index: {2}]  }
   0x1   :  { %18 = vsyncpa [#allocation6], 0 }
   0x2   :  { %19 = vsyncpa [#allocation9], 0 }
   0x3   :  { %20 = vsyncpa [#allocation12], 0 }
   0x4   :  { %21 = vsyncpa [#allocation15], 0 }
   0x5   :  { %22 = vsyncpa [#allocation4], 0 }
   0x6   :  { %23 = vsyncpa [#allocation19], 0  ;;  %s864_s17 = smov [#allocation5]   ;;  %s865_s19 = smov [#allocation8]  }
   0x7   :  { %s42_s18 = sshll.u32 %s864_s17, 4  ;;  %s61_s20 = sshll.u32 %s865_s19, 4  ;;  %s43_s18 = int_to_ptr.vmem [resolvable:$true] %s42_s18  ;;  %s942_s20 = int_to_ptr.vmem [resolvable:$true] %s61_s20 }
   0x8   :  { %s586_s23 = scalar_lea.hbm %s1142_s1, 16 }
   0x9   :  { %p587_p0 = scmp.ne.s32.totalorder %s1142_s1, %s586_s23  ;;  %p590_p1 = scmp.lt.u32.totalorder %s586_s23, %s1142_s1 }
   0xb   :  { %p592_p2 = pnand %p590_p1, %p587_p0 }
   0xd   :  { %595 = shalt.err (!%p592_p2)
}
   0xe   :  { %s596_s28 = scalar_lea.vmem %s43_s18, 16  ;;  %s600_s29 = scalar_lea.vmem %s43_s18, 32 }
   0xf   :  { %p597_p3 = scmp.ne.s32.totalorder %s43_s18, %s596_s28  ;;  %p601_p4 = scmp.lt.s32.totalorder %s43_s18, %s43_s18 }
  0x10   :  { %p602_p5 = scmp.lt.s32.totalorder %s600_s29, %s596_s28 }
  0x12   :  { %p603_p6 = por %p602_p5, %p601_p4 }
  0x14   :  { %p604_p7 = pnand %p603_p6, %p597_p3 }
  0x16   :  { %607 = shalt.err (!%p604_p7)
}
  0x17   :  { %45 = dma.hbm_to_vmem [thread:$0]  %s1142_s1, 16, %s43_s18, [#allocation6]  }
  0x18   :  { %s608_s15 = scalar_lea.hbm %s1144_s3, 256 }
  0x19   :  { %p609_p8 = scmp.ne.s32.totalorder %s1144_s3, %s608_s15  ;;  %p612_p9 = scmp.lt.u32.totalorder %s608_s15, %s1144_s3 }
  0x1b   :  { %p614_p10 = pnand %p612_p9, %p609_p8 }
  0x1d   :  { %617 = shalt.err (!%p614_p10)
}
  0x1e   :  { %s618_s22 = scalar_lea.vmem %s942_s20, 256  ;;  %p623_p12 = scmp.lt.s32.totalorder %s942_s20, %s942_s20 }
  0x1f   :  { %p619_p11 = scmp.ne.s32.totalorder %s942_s20, %s618_s22  ;;  %p624_p13 = scmp.lt.s32.totalorder %s618_s22, %s618_s22 }
  0x21   :  { %p625_p0 = por %p624_p13, %p623_p12 }
  0x23   :  { %p626_p1 = pnand %p625_p0, %p619_p11 }
  0x25   :  { %629 = shalt.err (!%p626_p1)
}
  0x26   :  { %s866_s1 = smov 64   ;;  %s867_s18 = smov 4  }
  0x27   :  { %67 = dma.hbm_to_vmem [thread:$0]  %s1144_s3, 256, %s942_s20, [#allocation9], %s866_s1, %s866_s1, %s867_s18  }
  0x28   :  { %s868_s25 = smov [#allocation11]   ;;  %s869_s27 = smov [#allocation14]  }
  0x29   :  { %s83_s26 = sshll.u32 %s868_s25, 4  ;;  %s105_s28 = sshll.u32 %s869_s27, 4  ;;  %s84_s26 = int_to_ptr.vmem [resolvable:$true] %s83_s26  ;;  %s976_s28 = int_to_ptr.vmem [resolvable:$true] %s105_s28 }
  0x2a   :  { %s630_s12 = scalar_lea.hbm %s1146_s5, 256 }
  0x2b   :  { %p631_p2 = scmp.ne.s32.totalorder %s1146_s5, %s630_s12  ;;  %p634_p3 = scmp.lt.u32.totalorder %s630_s12, %s1146_s5 }
  0x2d   :  { %p636_p4 = pnand %p634_p3, %p631_p2 }
  0x2f   :  { %639 = shalt.err (!%p636_p4)
}
  0x30   :  { %s640_s3 = scalar_lea.vmem %s84_s26, 256  ;;  %p645_p6 = scmp.lt.s32.totalorder %s84_s26, %s84_s26 }
  0x31   :  { %p641_p5 = scmp.ne.s32.totalorder %s84_s26, %s640_s3  ;;  %p646_p7 = scmp.lt.s32.totalorder %s640_s3, %s640_s3 }
  0x33   :  { %p647_p8 = por %p646_p7, %p645_p6 }
  0x35   :  { %p648_p9 = pnand %p647_p8, %p641_p5 }
  0x37   :  { %651 = shalt.err (!%p648_p9)
}
  0x38   :  { %89 = dma.hbm_to_vmem [thread:$0]  %s1146_s5, 256, %s84_s26, [#allocation12], %s866_s1, %s866_s1, %s867_s18  }
  0x39   :  { %s652_s22 = scalar_lea.hbm %s1148_s7, 256 }
  0x3a   :  { %p653_p10 = scmp.ne.s32.totalorder %s1148_s7, %s652_s22  ;;  %p656_p11 = scmp.lt.u32.totalorder %s652_s22, %s1148_s7 }
  0x3c   :  { %p658_p12 = pnand %p656_p11, %p653_p10 }
  0x3e   :  { %661 = shalt.err (!%p658_p12)
}
  0x3f   :  { %s662_s29 = scalar_lea.vmem %s976_s28, 256  ;;  %p667_p0 = scmp.lt.s32.totalorder %s976_s28, %s976_s28 }
  0x40   :  { %p663_p13 = scmp.ne.s32.totalorder %s976_s28, %s662_s29  ;;  %p668_p1 = scmp.lt.s32.totalorder %s662_s29, %s662_s29 }
  0x42   :  { %p669_p2 = por %p668_p1, %p667_p0 }
  0x44   :  { %p670_p3 = pnand %p669_p2, %p663_p13 }
  0x46   :  { %673 = shalt.err (!%p670_p3)
}
  0x47   :  { %111 = dma.hbm_to_vmem [thread:$0]  %s1148_s7, 256, %s976_s28, [#allocation15], %s866_s1, %s866_s1, %s867_s18  }
  0x48   :  { %s870_s30 = smov [#allocation2]   ;;  %s674_s15 = scalar_lea.hbm %s1141_s0, 256 }
  0x49   :  { %s29_s12 = sshll.u32 %s870_s30, 4  ;;  %p675_p4 = scmp.ne.s32.totalorder %s1141_s0, %s674_s15  ;;  %s30_s12 = int_to_ptr.vmem [resolvable:$true] %s29_s12 }
  0x4a   :  { %p678_p5 = scmp.lt.u32.totalorder %s674_s15, %s1141_s0 }
  0x4c   :  { %p680_p6 = pnand %p678_p5, %p675_p4 }
  0x4e   :  { %683 = shalt.err (!%p680_p6)
}
  0x4f   :  { %s684_s19 = scalar_lea.vmem %s30_s12, 256  ;;  %p689_p8 = scmp.lt.s32.totalorder %s30_s12, %s30_s12 }
  0x50   :  { %p685_p7 = scmp.ne.s32.totalorder %s30_s12, %s684_s19  ;;  %p690_p9 = scmp.lt.s32.totalorder %s684_s19, %s684_s19 }
  0x52   :  { %p691_p10 = por %p690_p9, %p689_p8 }
  0x54   :  { %p692_p11 = pnand %p691_p10, %p685_p7 }
  0x56   :  { %695 = shalt.err (!%p692_p11)
}
  0x57   :  { %s871_s7 = smov 128   ;;  %s872_s28 = smov 8  }
  0x58   :  { %35 = dma.hbm_to_vmem [thread:$0]  %s1141_s0, 256, %s30_s12, [#allocation3], %s871_s7, %s871_s7, %s872_s28  }
  0x59   :  { %s873_s23 = smov [#allocation7]   ;;  %s874_s25 = smov [#allocation10]  }
  0x5a   :  { %s52_s24 = sshll.u32 %s873_s23, 4  ;;  %s74_s27 = sshll.u32 %s874_s25, 4  ;;  %s53_s24 = int_to_ptr.vmem [resolvable:$true] %s52_s24  ;;  %s75_s27 = int_to_ptr.vmem [resolvable:$true] %s74_s27 }
  0x5b   :  { %s696_s26 = scalar_lea.hbm %s1143_s2, 16 }
  0x5c   :  { %p697_p12 = scmp.ne.s32.totalorder %s1143_s2, %s696_s26  ;;  %p700_p13 = scmp.lt.u32.totalorder %s696_s26, %s1143_s2 }
  0x5e   :  { %p702_p0 = pnand %p700_p13, %p697_p12 }
  0x60   :  { %705 = shalt.err (!%p702_p0)
}
  0x61   :  { %s706_s0 = scalar_lea.vmem %s53_s24, 16  ;;  %s710_s12 = scalar_lea.vmem %s53_s24, 32 }
  0x62   :  { %p707_p1 = scmp.ne.s32.totalorder %s53_s24, %s706_s0  ;;  %p711_p2 = scmp.lt.s32.totalorder %s53_s24, %s53_s24 }
  0x63   :  { %p712_p3 = scmp.lt.s32.totalorder %s710_s12, %s706_s0 }
  0x65   :  { %p713_p4 = por %p712_p3, %p711_p2 }
  0x67   :  { %p714_p5 = pnand %p713_p4, %p707_p1 }
  0x69   :  { %717 = shalt.err (!%p714_p5)
}
  0x6a   :  { %55 = dma.hbm_to_vmem [thread:$0]  %s1143_s2, 16, %s53_s24, [#allocation6]  }
  0x6b   :  { %s718_s19 = scalar_lea.hbm %s1145_s4, 16 }
  0x6c   :  { %p719_p6 = scmp.ne.s32.totalorder %s1145_s4, %s718_s19  ;;  %p722_p7 = scmp.lt.u32.totalorder %s718_s19, %s1145_s4 }
  0x6e   :  { %p724_p8 = pnand %p722_p7, %p719_p6 }
  0x70   :  { %727 = shalt.err (!%p724_p8)
}
  0x71   :  { %s728_s23 = scalar_lea.vmem %s75_s27, 16  ;;  %s732_s25 = scalar_lea.vmem %s75_s27, 32 }
  0x72   :  { %p729_p9 = scmp.ne.s32.totalorder %s75_s27, %s728_s23  ;;  %p733_p10 = scmp.lt.s32.totalorder %s75_s27, %s75_s27 }
  0x73   :  { %p734_p11 = scmp.lt.s32.totalorder %s732_s25, %s728_s23 }
  0x75   :  { %p735_p12 = por %p734_p11, %p733_p10 }
  0x77   :  { %p736_p13 = pnand %p735_p12, %p729_p9 }
  0x79   :  { %739 = shalt.err (!%p736_p13)
}
  0x7a   :  { %77 = dma.hbm_to_vmem [thread:$0]  %s1145_s4, 16, %s75_s27, [#allocation9]  }
  0x7b   :  { %s875_s29 = smov [#allocation13]   ;;  %s876_s26 = smov [#allocation16]  }
  0x7c   :  { %s96_s5 = sshll.u32 %s875_s29, 4  ;;  %s118_s30 = sshll.u32 %s876_s26, 4  ;;  %s97_s5 = int_to_ptr.vmem [resolvable:$true] %s96_s5  ;;  %s119_s30 = int_to_ptr.vmem [resolvable:$true] %s118_s30 }
  0x7d   :  { %s740_s15 = scalar_lea.hbm %s1147_s6, 16 }
  0x7e   :  { %p741_p0 = scmp.ne.s32.totalorder %s1147_s6, %s740_s15  ;;  %p744_p1 = scmp.lt.u32.totalorder %s740_s15, %s1147_s6 }
  0x80   :  { %p746_p2 = pnand %p744_p1, %p741_p0 }
  0x82   :  { %749 = shalt.err (!%p746_p2)
}
  0x83   :  { %s750_s4 = scalar_lea.vmem %s97_s5, 16  ;;  %s754_s27 = scalar_lea.vmem %s97_s5, 32 }
  0x84   :  { %p751_p3 = scmp.ne.s32.totalorder %s97_s5, %s750_s4  ;;  %p755_p4 = scmp.lt.s32.totalorder %s97_s5, %s97_s5 }
  0x85   :  { %p756_p5 = scmp.lt.s32.totalorder %s754_s27, %s750_s4 }
  0x87   :  { %p757_p6 = por %p756_p5, %p755_p4 }
  0x89   :  { %p758_p7 = pnand %p757_p6, %p751_p3 }
  0x8b   :  { %761 = shalt.err (!%p758_p7)
}
  0x8c   :  { %99 = dma.hbm_to_vmem [thread:$0]  %s1147_s6, 16, %s97_s5, [#allocation12]  }
  0x8d   :  { %s762_s28 = scalar_lea.hbm %s1149_s8, 16 }
  0x8e   :  { %p763_p8 = scmp.ne.s32.totalorder %s1149_s8, %s762_s28  ;;  %p766_p9 = scmp.lt.u32.totalorder %s762_s28, %s1149_s8 }
  0x90   :  { %p768_p10 = pnand %p766_p9, %p763_p8 }
  0x92   :  { %771 = shalt.err (!%p768_p10)
}
  0x93   :  { %s772_s2 = scalar_lea.vmem %s119_s30, 16  ;;  %s776_s24 = scalar_lea.vmem %s119_s30, 32 }
  0x94   :  { %p773_p11 = scmp.ne.s32.totalorder %s119_s30, %s772_s2  ;;  %p777_p12 = scmp.lt.s32.totalorder %s119_s30, %s119_s30 }
  0x95   :  { %p778_p13 = scmp.lt.s32.totalorder %s776_s24, %s772_s2 }
  0x97   :  { %p779_p0 = por %p778_p13, %p777_p12 }
  0x99   :  { %p780_p1 = pnand %p779_p0, %p773_p11 }
  0x9b   :  { %783 = shalt.err (!%p780_p1)
}
  0x9c   :  { %121 = dma.hbm_to_vmem [thread:$0]  %s1149_s8, 16, %s119_s30, [#allocation15]  }
  0x9d   :  { %850 = dma.done.wait [#allocation3], 256  }
  0x9e   :  { %851 = vsyncadd [#allocation3], 4294967040 }
  0x9f   :  { %852 = dma.done.wait [#allocation6], 32  }
  0xa0   :  { %853 = vsyncadd [#allocation6], 4294967264 }
  0xa1   :  { %854 = dma.done.wait [#allocation9], 272  }
  0xa2   :  { %855 = vsyncadd [#allocation9], 4294967024 }
  0xa3   :  { %856 = dma.done.wait [#allocation12], 272  }
  0xa4   :  { %857 = vsyncadd [#allocation12], 4294967024 }
  0xa5   :  { %858 = dma.done.wait [#allocation15], 272  }
  0xa6   :  { %859 = vsyncadd [#allocation15], 4294967024  ;;  %vm154_vm0 = vcmask 261120   ;;  %v150_v0 = vld [vmem:[#allocation2] sm:$0xff]  ;;  %v151_v1 = vld [vmem:[#allocation2 + $0x8] sm:$0xff]  ;;  %v877_v16 = vmov 0.0  }
  0xa7   :  { %v155_v2 = vsel %vm154_vm0, %v150_v0, 0.0  ;;  %v158_v3 = vsel %vm154_vm0, %v151_v1, 0.0  ;;  %v572_v14 = vld [vmem:[#allocation8] sm:$0xff]   ;;  %v573_v15 = vld [vmem:[#allocation11] sm:$0xff]   ;;  %530 = vmatprep.subr.bf16.mxu0 %v877_v16  ;;  %538 = vmatprep.subr.bf16.mxu1 %v877_v16  ;;  %v574_v17 = vld [vmem:[#allocation8 + $0x8] sm:$0xff]   ;;  %vm878_vm1 = vmmov 0  }
  0xa8   :  { %156 = vadd.xlane.f32.xlu0 %v155_v2  ;;  %531 = vmatpush3.bf16.msra.mxu0 %v572_v14  ;;  %v575_v18 = vld [vmem:[#allocation11 + $0x8] sm:$0xff]   ;;  %v576_v45 = vld [vmem:[#allocation14] sm:$0xff]   ;;  %v577_v47 = vld [vmem:[#allocation14 + $0x8] sm:$0xff]   ;;  %vm422_vm6 = vcmask 257024   ;;  %s879_s8 = smov [#allocation18]   ;;  %s880_s26 = smov [#allocation17]  }
  0xa9   :  { %539 = vmatpush3.bf16.msra.mxu1 %v573_v15  ;;  %532 = vmatprep.subr.bf16.mxu0 %v877_v16  ;;  %v495_v37 = vld [vmem:[#allocation5] ss:$0 sm:$0xff]  ;;  %v496_v41 = vld [vmem:[#allocation7] ss:$0 sm:$0xff]  ;;  %v497_v48 = vld [vmem:[#allocation10] ss:$0 sm:$0xff] }
  0xaa   :  { %540 = vmatprep.subr.bf16.mxu1 %v877_v16  ;;  %534 = vmatprep.mubr.msk.bf16.mxu0 %vm878_vm1, %v877_v16  ;;  %v501_v49 = vld [vmem:[#allocation13] ss:$0 sm:$0xff]  ;;  %s460_s5 = sshll.u32 %s879_s8, 4  ;;  %s448_s30 = sshll.u32 %s880_s26, 4  ;;  %s461_s5 = int_to_ptr.vmem [resolvable:$true] %s460_s5  ;;  %s1086_s30 = int_to_ptr.vmem [resolvable:$true] %s448_s30 }
  0xab   :  { %542 = vmatprep.mubr.msk.bf16.mxu1 %vm878_vm1, %v877_v16  ;;  %s784_s13 = scalar_lea.vmem %s461_s5, 128  ;;  %p789_p3 = scmp.lt.s32.totalorder %s461_s5, %s461_s5 }
  0xac   :  { %159 = vadd.xlane.f32.xlu0 %v158_v3  ;;  %533 = vmatpush3.bf16.msra.mxu0 %v574_v17  ;;  %v505_v3 = vld [vmem:[#allocation16] ss:$0 sm:$0xff]  ;;  %p785_p2 = scmp.ne.s32.totalorder %s461_s5, %s784_s13  ;;  %p790_p4 = scmp.lt.s32.totalorder %s784_s13, %s784_s13 }
  0xad   :  { %541 = vmatpush3.bf16.msra.mxu1 %v575_v18  ;;  %546 = vmatprep.subr.bf16.mxu0 %v877_v16 }
  0xae   :  { %p791_p5 = por %p790_p4, %p789_p3 }
  0xb0   :  { %p792_p6 = pnand %p791_p5, %p785_p2 }
 0x135   :  { %v157_v4 = vpop.xlane.xlu0 %156 }
 0x136   :  { %v162_v5 = vmul.f32 0.03125, %v157_v4 }
 0x138   :  { %v164_v6 = vsub.f32 %v150_v0, %v162_v5 }
 0x139   :  { %v160_v7 = vpop.xlane.xlu0 %159 }
 0x13a   :  { %v163_v8 = vmul.f32 0.03125, %v160_v7  ;;  %v166_v9 = vmul.f32 %v164_v6, %v164_v6 }
 0x13c   :  { %v165_v10 = vsub.f32 %v151_v1, %v163_v8  ;;  %v168_v11 = vsel %vm154_vm0, %v166_v9, 0.0 }
 0x13d   :  { %169 = vadd.xlane.f32.xlu1 %v168_v11 }
 0x13e   :  { %v167_v12 = vmul.f32 %v165_v10, %v165_v10 }
 0x140   :  { %v171_v13 = vsel %vm154_vm0, %v167_v12, 0.0 }
 0x141   :  { %172 = vadd.xlane.f32.xlu1 %v171_v13 }
 0x1ca   :  { %v170_v19 = vpop.xlane.xlu1 %169 }
 0x1cb   :  { %v174_v20 = vmul.f32 0.032258064, %v170_v19 }
 0x1cd   :  { %578 = vrsqrt.f32 %v174_v20  ;;  %vm178_vm2 = vcmp.eq.f32.partialorder %v174_v20, inf  ;;  %v181_v25 = vand.u32 2147483648, %v174_v20  ;;  %vm180_vm3 = vcmp.eq.f32.partialorder %v174_v20, 0.0 }
 0x1ce   :  { %v173_v21 = vpop.xlane.xlu1 %172 }
 0x1cf   :  { %v175_v22 = vmul.f32 0.032258064, %v173_v21 }
 0x1d1   :  { %580 = vrsqrt.f32 %v175_v22  ;;  %vm185_vm4 = vcmp.eq.f32.partialorder %v175_v22, inf  ;;  %v188_v31 = vand.u32 2147483648, %v175_v22  ;;  %vm187_vm5 = vcmp.eq.f32.partialorder %v175_v22, 0.0 }
 0x1d7   :  { %v579_v23 = vpop.eup %578 }
 0x1d8   :  { %v177_v24 = vmul.f32 %v579_v23, %v174_v20 }
 0x1da   :  { %v179_v26 = vsel %vm178_vm2, %v174_v20, %v177_v24 }
 0x1db   :  { %v581_v27 = vpop.eup %580  ;;  %v182_v28 = vsel %vm180_vm3, %v181_v25, %v179_v26 }
 0x1dc   :  { %v190_v29 = vadd.f32 1e-07, %v182_v28  ;;  %v184_v30 = vmul.f32 %v581_v27, %v175_v22 }
 0x1de   :  { %582 = vrcp.f32 %v190_v29  ;;  %v186_v32 = vsel %vm185_vm4, %v175_v22, %v184_v30 }
 0x1df   :  { %v189_v33 = vsel %vm187_vm5, %v188_v31, %v186_v32 }
 0x1e0   :  { %v191_v34 = vadd.f32 1e-07, %v189_v33 }
 0x1e2   :  { %584 = vrcp.f32 %v191_v34 }
 0x1e8   :  { %v583_v35 = vpop.eup %582 }
 0x1e9   :  { %v196_v36 = vmul.f32 %v583_v35, %v164_v6 }
 0x1eb   :  { %v204_v40 = vmul.f32 %v495_v37, %v196_v36 }
 0x1ec   :  { %v585_v38 = vpop.eup %584 }
 0x1ed   :  { %v197_v39 = vmul.f32 %v585_v38, %v165_v10  ;;  %v212_v43 = vadd.f32 %v496_v41, %v204_v40 }
 0x1ef   :  { %v205_v42 = vmul.f32 %v495_v37, %v197_v39 }
 0x1f1   :  { %v213_v44 = vadd.f32 %v496_v41, %v205_v42 }
 0x1f3   :  { %v229_v46 = vpack.c.bf16 %v213_v44, %v212_v43 }
 0x1f5   :  { %535 = vmatmul.mubr.msk.bf16.vlgmr.msra.gmra.mrb[0].mxu0 %vm154_vm0, %v229_v46  ;;  %543 = vmatmul.mubr.msk.bf16.vlgmr.msra.gmra.mrb[0].mxu1 %vm154_vm0, %v229_v46 }
 0x1f6   :  { %547 = vmatpush3.bf16.msra.mxu0 %v576_v45  ;;  %550 = vmatprep.mubr.msk.bf16.mxu0 %vm878_vm1, %v877_v16 }
 0x1f7   :  { %548 = vmatprep.subr.bf16.mxu0 %v877_v16 }
 0x1fa   :  { %549 = vmatpush3.bf16.msra.mxu0 %v577_v47 }
 0x1fd   :  { %551 = vmatmul.mubr.msk.bf16.vlgmr.msra.gmra.mrb[4].mxu0 %vm154_vm0, %v229_v46 }
 0x2c8   :  { %v285_v50 = vpop.f32.mrb[0].mxu0  ;;  %v344_v51 = vpop.f32.mrb[0].mxu1 }
 0x2c9   :  { %v286_v52 = vadd.f32 %v497_v48, %v285_v50  ;;  %v345_v53 = vadd.f32 %v501_v49, %v344_v51  ;;  %v536_v54 = vpop.f32.mrb[1].mxu0  ;;  %v544_v55 = vpop.f32.mrb[1].mxu1 }
 0x2ca   :  { %v288_v56 = vpop.f32.mrb[2].mxu0  ;;  %v347_v57 = vpop.f32.mrb[2].mxu1 }
 0x2cb   :  { %v410_v58 = vmul.f32 0.35355338, %v286_v52  ;;  %v517_v59 = vpack.c.bf16 %v345_v53, %v345_v53  ;;  %v289_v60 = vadd.f32 %v497_v48, %v288_v56  ;;  %v348_v61 = vadd.f32 %v501_v49, %v347_v57  ;;  %v537_v62 = vpop.f32.mrb[3].mxu0  ;;  %v545_v63 = vpop.f32.mrb[3].mxu1 }
 0x2cd   :  { %v515_v0 = vpack.c.bf16 %v410_v58, %v410_v58  ;;  %v411_v1 = vmul.f32 0.35355338, %v289_v60  ;;  %v518_v2 = vpack.c.bf16 %v348_v61, %v348_v61  ;;  %432 = vst.msk [vmem:[#allocation18] sm:$0xf] %vm422_vm6, %v517_v59 }
 0x2cf   :  { %v516_v4 = vpack.c.bf16 %v411_v1, %v411_v1  ;;  %423 = vst.msk [vmem:[#allocation17] sm:$0xf] %vm422_vm6, %v515_v0  ;;  %433 = vst.msk [vmem:[#allocation18 + $0x4] sm:$0xf] %vm422_vm6, %v518_v2 }
 0x2d0   :  { %v403_v5 = vpop.f32.mrb[4].mxu0 }
 0x2d1   :  { %795 = shalt.err (!%p792_p6)
}
 0x2d2   :  { %s796_s0 = scalar_lea.hbm %s1151_s10, 128 }
 0x2d3   :  { %p797_p7 = scmp.ne.s32.totalorder %s1151_s10, %s796_s0  ;;  %p800_p8 = scmp.lt.u32.totalorder %s796_s0, %s1151_s10 }
 0x2d5   :  { %p802_p9 = pnand %p800_p8, %p797_p7 }
 0x2d7   :  { %805 = shalt.err (!%p802_p9)
}
 0x2d8   :  { %466 = dma.vmem_to_hbm [thread:$0]  %s461_s5, 128, %s1151_s10, [#allocation19], %s866_s1, %s866_s1, %s867_s18   ;;  %v404_v6 = vadd.f32 %v505_v3, %v403_v5  ;;  %424 = vst.msk [vmem:[#allocation17 + $0x4] sm:$0xf] %vm422_vm6, %v516_v4  ;;  %v552_v7 = vpop.f32.mrb[5].mxu0 }
 0x2d9   :  { %s881_s17 = smov [#allocation20]   ;;  %v406_v8 = vpop.f32.mrb[6].mxu0  ;;  %s806_s7 = scalar_lea.vmem %s1086_s30, 128 }
 0x2da   :  { %s472_s19 = sshll.u32 %s881_s17, 4  ;;  %p807_p10 = scmp.ne.s32.totalorder %s1086_s30, %s806_s7  ;;  %s473_s19 = int_to_ptr.vmem [resolvable:$true] %s472_s19 }
 0x2db   :  { %p811_p11 = scmp.lt.s32.totalorder %s1086_s30, %s1086_s30  ;;  %p812_p12 = scmp.lt.s32.totalorder %s806_s7, %s806_s7 }
 0x2dd   :  { %p813_p13 = por %p812_p12, %p811_p11 }
 0x2df   :  { %p814_p0 = pnand %p813_p13, %p807_p10 }
 0x2e1   :  { %817 = shalt.err (!%p814_p0)
}
 0x2e2   :  { %s818_s22 = scalar_lea.hbm %s1150_s9, 128 }
 0x2e3   :  { %p819_p1 = scmp.ne.s32.totalorder %s1150_s9, %s818_s22  ;;  %p822_p2 = scmp.lt.u32.totalorder %s818_s22, %s1150_s9 }
 0x2e5   :  { %p824_p3 = pnand %p822_p2, %p819_p1 }
 0x2e7   :  { %827 = shalt.err (!%p824_p3)
}
 0x2e8   :  { %454 = dma.vmem_to_hbm [thread:$0]  %s1086_s30, 128, %s1150_s9, [#allocation4], %s866_s1, %s866_s1, %s867_s18   ;;  %v519_v9 = vpack.c.bf16 %v404_v6, %v404_v6  ;;  %v407_v10 = vadd.f32 %v505_v3, %v406_v8  ;;  %v553_v11 = vpop.f32.mrb[7].mxu0 }
 0x2e9   :  { %s828_s29 = scalar_lea.vmem %s473_s19, 128  ;;  %p833_p5 = scmp.lt.s32.totalorder %s473_s19, %s473_s19 }
 0x2ea   :  { %441 = vst.msk [vmem:[#allocation20] sm:$0xf] %vm422_vm6, %v519_v9  ;;  %v520_v12 = vpack.c.bf16 %v407_v10, %v407_v10  ;;  %p829_p4 = scmp.ne.s32.totalorder %s473_s19, %s828_s29  ;;  %p834_p6 = scmp.lt.s32.totalorder %s828_s29, %s828_s29 }
 0x2ec   :  { %442 = vst.msk [vmem:[#allocation20 + $0x4] sm:$0xf] %vm422_vm6, %v520_v12  ;;  %p835_p7 = por %p834_p6, %p833_p5 }
 0x2ee   :  { %p836_p8 = pnand %p835_p7, %p829_p4 }
 0x2f0   :  { %839 = shalt.err (!%p836_p8)
}
 0x2f1   :  { %s840_s9 = scalar_lea.hbm %s1152_s11, 128 }
 0x2f2   :  { %p841_p9 = scmp.ne.s32.totalorder %s1152_s11, %s840_s9  ;;  %p844_p10 = scmp.lt.u32.totalorder %s840_s9, %s1152_s11 }
 0x2f4   :  { %p846_p11 = pnand %p844_p10, %p841_p9 }
 0x2f6   :  { %849 = shalt.err (!%p846_p11)
}
 0x2f7   :  { %478 = dma.vmem_to_hbm [thread:$0]  %s473_s19, 128, %s1152_s11, [#allocation19], %s866_s1, %s866_s1, %s867_s18  }
 0x2f8   :  { %860 = dma.done.wait [#allocation4], 128  }
 0x2f9   :  { %861 = vsyncadd [#allocation4], 4294967168 }
 0x2fa   :  { %862 = dma.done.wait [#allocation19], 256  }
 0x2fb   :  { %863 = vsyncadd [#allocation19], 4294967040 }
 0x2fc   :  { %488 = vsyncpa [#allocation3], 1 }
 0x2fd   :  { %489 = vsyncpa [#allocation6], 1 }
 0x2fe   :  { %490 = vsyncpa [#allocation9], 1 }
 0x2ff   :  { %491 = vsyncpa [#allocation12], 1 }
 0x300   :  { %492 = vsyncpa [#allocation15], 1 }
 0x301   :  { %493 = vsyncpa [#allocation4], 1 }
 0x302   :  { %494 = vsyncpa [#allocation19], 1 }

</bundles_post_ra>
